<compile_context>
chip_gen: v5e
topology: v5e:2x2
jax: 0.10.0
libtpu: 0.0.40
codegen_flags: <defaults>
</compile_context>

<pallas_src>
import functools
import math

import numpy as np

import jax
import jax.numpy as jnp
from jax.experimental import pallas as pl
from jax.experimental.pallas import tpu as pltpu


# ----------------------------------------------------------------------------
# Buffer construction: identical to the PyTorch __init__.
# ----------------------------------------------------------------------------
def make_positional_encoding(d_model: int, max_len: int = 5000) -> jnp.ndarray:
    position = jnp.arange(0, max_len, dtype=jnp.float32)[:, None]          # (L, 1)
    div_term = jnp.exp(
        jnp.arange(0, d_model, 2, dtype=jnp.float32)
        * (-math.log(10000.0) / d_model)
    )                                                                        # (D/2,)
    pe = jnp.zeros((max_len, d_model), dtype=jnp.float32)
    pe = pe.at[:, 0::2].set(jnp.sin(position * div_term))
    pe = pe.at[:, 1::2].set(jnp.cos(position * div_term))
    # torch: pe.unsqueeze(0).transpose(0, 1) -> (max_len, 1, d_model)
    return pe[:, None, :]


# ----------------------------------------------------------------------------
# Small integer helpers (int32-only ops so they lower everywhere).
# ----------------------------------------------------------------------------
def _as_i32(v: int) -> int:
    return int(np.asarray(v, dtype=np.uint32).view(np.int32))


_GOLDEN = _as_i32(0x9E3779B9)
_FMIX_C1 = _as_i32(0x85EBCA6B)
_FMIX_C2 = _as_i32(0xC2B2AE35)


def _srl(h, n: int):
    """Logical right shift of int32 by a static amount (ashr + mask)."""
    mask = jnp.int32((1 << (32 - n)) - 1)
    return (h >> n) & mask


def _keep_threshold_i32(keep_prob: float) -> int:
    """Signed-int32 threshold t s.t. P(random_i32 < t) == keep_prob."""
    t = int(round((keep_prob - 0.5) * 4294967296.0))
    return max(-(2 ** 31), min(2 ** 31 - 1, t))


# ----------------------------------------------------------------------------
# Pallas kernels (shape-generic: work for (ts, B, D) and flattened (ts, D)).
# ----------------------------------------------------------------------------
def _pe_add_kernel(x_ref, pe_ref, o_ref):
    """Eval-mode path: dropout is identity. pe block broadcasts over batch."""
    o_ref[...] = (x_ref[...] + pe_ref[...]).astype(o_ref.dtype)


def _pe_add_dropout_hw_kernel(seed_ref, x_ref, pe_ref, o_ref, *, keep_prob: float):
    """Training path using the hardware PRNG (~1 vector op / vreg for bits)."""
    y = x_ref[...] + pe_ref[...]                       # broadcast PE over batch

    # Distinct stream per grid step: mix the tile index into the seed.
    pltpu.prng_seed(seed_ref[0] ^ (pl.program_id(0) * jnp.int32(_GOLDEN)))
    bits = pltpu.prng_random_bits(x_ref.shape)
    if bits.dtype != jnp.int32:
        bits = pltpu.bitcast(bits, jnp.int32)

    # Single signed compare: P(bits < thr) == keep_prob for uniform 32-bit bits.
    keep = bits < jnp.int32(_keep_threshold_i32(keep_prob))
    inv_keep = jnp.float32(1.0 / keep_prob)
    o_ref[...] = jnp.where(keep, y * inv_keep, jnp.float32(0.0)).astype(o_ref.dtype)


def _pe_add_dropout_sw_kernel(seed_ref, x_ref, pe_ref, o_ref, *, keep_prob: float):
    """Portable fallback (interpret mode / non-TPU): counter-hash PRNG.

    Cheapened vs the old version: integer compare against a 24-bit threshold
    (no int->float convert, no fmul).
    """
    shape = x_ref.shape
    y = x_ref[...] + pe_ref[...]

    # Global element counter (distinct per tile via program_id offset).
    ctr = jax.lax.broadcasted_iota(jnp.int32, shape, 0) + pl.program_id(0) * shape[0]
    for ax in range(1, len(shape)):
        ctr = ctr * shape[ax] + jax.lax.broadcasted_iota(jnp.int32, shape, ax)

    h = ctr ^ (seed_ref[0] * jnp.int32(_GOLDEN))
    h = h ^ _srl(h, 16)
    h = h * jnp.int32(_FMIX_C1)
    h = h ^ _srl(h, 13)
    h = h * jnp.int32(_FMIX_C2)
    h = h ^ _srl(h, 16)
    u24 = _srl(h, 8)                                   # [0, 2^24)

    keep = u24 < jnp.int32(int(keep_prob * float(1 << 24)))
    inv_keep = jnp.float32(1.0 / keep_prob)
    o_ref[...] = jnp.where(keep, y * inv_keep, jnp.float32(0.0)).astype(o_ref.dtype)


# ----------------------------------------------------------------------------
# Wrapper
# ----------------------------------------------------------------------------
def _vmem_capacity_bytes() -> int:
    try:
        return int(pltpu.get_tpu_info().vmem_capacity_bytes)
    except Exception:
        return 64 << 20       # conservative default (v7x per-TC VMEM)


def _pick_tile_s(S: int, B: int, D: int, itemsize: int, vmem_cap: int) -> int:
    """Sequence tile: as big as the VMEM budget allows, but keep grid >= 2."""
    usable = int(vmem_cap * 0.75)                       # ~96 MiB on 128 MiB parts, ~48 on v7x
    target_x = (8 << 20) if vmem_cap <= (64 << 20) else (16 << 20)
    row_x = B * D * itemsize                            # one seq row of x (== out)
    row_all = 2 * (2 * row_x) + 2 * (D * itemsize)      # dbl-buffered x + out + pe per row
    ts_vmem = max(1, usable // max(1, row_all))
    ts_tgt = max(1, target_x // max(1, row_x))
    ts = min(ts_vmem, ts_tgt)
    if ts >= 8:
        ts = (ts // 8) * 8
    if ts >= S:
        # Whole sequence would fit in one tile: still split so >=2 (ideally 4)
        # grid steps exist and dimension_semantics=("parallel",) can shard
        # tiles across both v7x TensorCores.
        if S >= 32:
            ts = ((S + 3) // 4 + 7) // 8 * 8
        elif S >= 16:
            ts = ((S + 1) // 2 + 7) // 8 * 8
        else:
            ts = S
    return max(1, min(ts, S))


def positional_encoding_forward(
    x: jnp.ndarray,
    pe: jnp.ndarray,
    *,
    dropout_p: float = 0.1,
    training: bool = True,
    seed: int = 0,
    tile_s: int | None = None,
    donate_x: bool = False,
    use_hw_prng: bool | None = None,
) -> jnp.ndarray:
    """x: (S, B, D). pe: (max_len, 1, D) buffer from make_positional_encoding."""
    S, B, D = x.shape
    assert pe.ndim == 3 and pe.shape[1] == 1 and pe.shape[2] == D
    assert pe.shape[0] >= S, "sequence longer than positional-encoding buffer"

    if pe.dtype != x.dtype:
        # Halves pe DMA bytes for bf16 activations.
        # TODO(synk): torch mixed-dtype add would promote x to f32 instead.
        pe = pe.astype(x.dtype)

    if use_hw_prng is None:
        use_hw_prng = jax.default_backend() == "tpu"

    vmem_cap = _vmem_capacity_bytes()
    itemsize = x.dtype.itemsize

    # B == 1: flatten to (S, D) so the sublane dim is the sequence tile
    # (dense vregs, unmasked stores). pe aligns row-for-row, no broadcast.
    flatten = (B == 1)
    if flatten:
        x_k = x.reshape(S, D)
        pe_k = pe.reshape(pe.shape[0], D)
    else:
        x_k = x
        pe_k = pe

    ts = tile_s if tile_s is not None else _pick_tile_s(S, B, D, itemsize, vmem_cap)
    ts = int(min(max(1, ts), S))
    if flatten and ts < S:
        assert ts % 8 == 0, "flattened (B==1) path needs tile_s % 8 == 0"
    grid = (pl.cdiv(S, ts),)

    if flatten:
        x_spec = pl.BlockSpec((ts, D), lambda i: (i, 0))
        pe_spec = pl.BlockSpec((ts, D), lambda i: (i, 0))
        out_spec = pl.BlockSpec((ts, D), lambda i: (i, 0))
        out_shape = jax.ShapeDtypeStruct((S, D), x.dtype)
    else:
        x_spec = pl.BlockSpec((ts, B, D), lambda i: (i, 0, 0))
        pe_spec = pl.BlockSpec((ts, 1, D), lambda i: (i, 0, 0))
        out_spec = pl.BlockSpec((ts, B, D), lambda i: (i, 0, 0))
        out_shape = jax.ShapeDtypeStruct((S, B, D), x.dtype)

    # Accurate VMEM budget: double-buffered x, out, pe blocks + 25% margin,
    # capped at ~75% of this generation's physical VMEM.
    blk_x = ts * B * D * itemsize
    blk_pe = ts * D * pe.dtype.itemsize
    need = 2 * blk_x + 2 * blk_x + 2 * blk_pe
    vmem_limit = int(min(int(vmem_cap * 0.75), max(8 << 20, int(need * 1.25))))

    compiler_params = pltpu.CompilerParams(
        dimension_semantics=("parallel",),     # independent tiles -> megacore
        vmem_limit_bytes=vmem_limit,
    )

    if training and dropout_p > 0.0:
        keep_prob = 1.0 - float(dropout_p)
        kern = _pe_add_dropout_hw_kernel if use_hw_prng else _pe_add_dropout_sw_kernel
        kernel = functools.partial(kern, keep_prob=keep_prob)
        seed_arr = jnp.asarray([seed], dtype=jnp.int32)
        out = pl.pallas_call(
            kernel,
            out_shape=out_shape,
            grid=grid,
            in_specs=[
                pl.BlockSpec(memory_space=pltpu.MemorySpace.SMEM),   # seed
                x_spec,                                              # x
                pe_spec,                                             # pe
            ],
            out_specs=out_spec,
            compiler_params=compiler_params,
            input_output_aliases=({1: 0} if donate_x else {}),
        )(seed_arr, x_k, pe_k)
    else:
        out = pl.pallas_call(
            _pe_add_kernel,
            out_shape=out_shape,
            grid=grid,
            in_specs=[x_spec, pe_spec],
            out_specs=out_spec,
            compiler_params=compiler_params,
            input_output_aliases=({0: 0} if donate_x else {}),
        )(x_k, pe_k)

    return out.reshape(S, B, D) if flatten else out


# ----------------------------------------------------------------------------
# Demo / self-check
# ----------------------------------------------------------------------------
if __name__ == "__main__":
    SEQ, BATCH, D_MODEL, MAX_LEN = 16, 4, 128, 64
    TILE_S = 8                                 # force a 2-step grid in the demo

    key = jax.random.PRNGKey(0)
    x = jax.random.normal(key, (SEQ, BATCH, D_MODEL), dtype=jnp.float32)

    pe = make_positional_encoding(D_MODEL, MAX_LEN)           # (MAX_LEN, 1, D)
    ref = x + pe[:SEQ, :]                                     # plain-JAX reference

    # --- Eval mode: dropout is identity; exact numerical check. -------------
    out_eval = positional_encoding_forward(
        x, pe, dropout_p=0.1, training=False, tile_s=TILE_S
    )
    out_eval = jax.block_until_ready(out_eval)
    assert out_eval.shape == (SEQ, BATCH, D_MODEL)
    assert jnp.allclose(out_eval, ref, atol=1e-6), "eval-mode mismatch"

    # --- Eval mode, ragged tail: S not a multiple of the tile. --------------
    S2 = 12
    x2 = x[:S2]
    ref2 = x2 + pe[:S2, :]
    out2 = positional_encoding_forward(
        x2, pe, dropout_p=0.1, training=False, tile_s=TILE_S
    )
    out2 = jax.block_until_ready(out2)
    assert jnp.allclose(out2, ref2, atol=1e-6), "ragged-tail mismatch"

    # --- Eval mode, B == 1 (flattened sublane-dense path). ------------------
    x1 = x[:, :1, :]
    ref1 = x1 + pe[:SEQ, :]
    out1 = positional_encoding_forward(x1, pe, dropout_p=0.1, training=False)
    out1 = jax.block_until_ready(out1)
    assert out1.shape == (SEQ, 1, D_MODEL)
    assert jnp.allclose(out1, ref1, atol=1e-6), "B==1 path mismatch"

    # --- Training mode: hardware-PRNG dropout. -------------------------------
    keep_prob = 0.9
    out_train = positional_encoding_forward(
        x, pe, dropout_p=0.1, training=True, seed=1234, tile_s=TILE_S
    )
    out_train = jax.block_until_ready(out_train)
    assert out_train.shape == (SEQ, BATCH, D_MODEL)

    scaled_ref = ref / keep_prob
    ok = jnp.logical_or(
        jnp.isclose(out_train, scaled_ref, rtol=1e-5, atol=1e-5),
        out_train == 0.0,
    )
    assert bool(jnp.all(ok)), "train-mode dropout semantics mismatch"
    drop_frac = float(jnp.mean((out_train == 0.0).astype(jnp.float32)))
    assert 0.02 < drop_frac < 0.30, f"dropout fraction looks wrong: {drop_frac}"

    # --- Training mode: portable software-hash fallback path. ----------------
    out_sw = positional_encoding_forward(
        x, pe, dropout_p=0.1, training=True, seed=77, tile_s=TILE_S,
        use_hw_prng=False,
    )
    out_sw = jax.block_until_ready(out_sw)
    ok_sw = jnp.logical_or(
        jnp.isclose(out_sw, scaled_ref, rtol=1e-5, atol=1e-5),
        out_sw == 0.0,
    )
    assert bool(jnp.all(ok_sw)), "sw-fallback dropout semantics mismatch"
    drop_frac_sw = float(jnp.mean((out_sw == 0.0).astype(jnp.float32)))
    assert 0.02 < drop_frac_sw < 0.30, f"sw dropout fraction looks wrong: {drop_frac_sw}"

    print("KERNEL_OK")
</pallas_src>

<mosaic_0001>
module attributes {stable_mosaic.version = 11 : i64} {
  func.func @_pe_add_kernel(%arg0: i32, %arg1: memref<8x4x128xf32, #tpu.memory_space<vmem>>, %arg2: memref<8x1x128xf32, #tpu.memory_space<vmem>>, %arg3: memref<8x4x128xf32, #tpu.memory_space<vmem>>) attributes {dimension_semantics = [#tpu.dimension_semantics<parallel>], iteration_bounds = array<i64: 2>, scalar_prefetch = 0 : i64, scratch_operands = 0 : i64, tpu.core_type = #tpu.core_type<tc>, window_params = [{transform_indices = @transform_0, window_bounds = array<i64: 8, 4, 128>}, {transform_indices = @transform_1, window_bounds = array<i64: 8, 1, 128>}, {transform_indices = @transform_2, window_bounds = array<i64: 8, 4, 128>}]} {
    %c0 = arith.constant 0 : index
    %c0_0 = arith.constant 0 : index
    %c0_1 = arith.constant 0 : index
    %0 = vector.load %arg1[%c0, %c0_0, %c0_1] : memref<8x4x128xf32, #tpu.memory_space<vmem>>, vector<8x4x128xf32>
    %c0_2 = arith.constant 0 : index
    %c0_3 = arith.constant 0 : index
    %c0_4 = arith.constant 0 : index
    %1 = vector.load %arg2[%c0_2, %c0_3, %c0_4] : memref<8x1x128xf32, #tpu.memory_space<vmem>>, vector<8x1x128xf32>
    %2 = vector.broadcast %1 : vector<8x1x128xf32> to vector<8x4x128xf32>
    %3 = arith.addf %0, %2 : vector<8x4x128xf32>
    %c0_5 = arith.constant 0 : index
    %c0_6 = arith.constant 0 : index
    %c0_7 = arith.constant 0 : index
    %4 = vector.load %arg3[%c0_5, %c0_6, %c0_7] : memref<8x4x128xf32, #tpu.memory_space<vmem>>, vector<8x4x128xf32>
    tpu.vector_store %arg3[%c0_5, %c0_6, %c0_7], %3 {strides = array<i32>} : memref<8x4x128xf32, #tpu.memory_space<vmem>>, vector<8x4x128xf32>,
    return
  }
  func.func @transform_0(%arg0: i32) -> (i32, i32, i32) {
    %c0_i32 = arith.constant 0 : i32
    %c0_i32_0 = arith.constant 0 : i32
    %c0_i32_1 = arith.constant 0 : i32
    return %arg0, %c0_i32, %c0_i32_0 : i32, i32, i32
  }
  func.func @transform_1(%arg0: i32) -> (i32, i32, i32) {
    %c0_i32 = arith.constant 0 : i32
    %c0_i32_0 = arith.constant 0 : i32
    %c0_i32_1 = arith.constant 0 : i32
    return %arg0, %c0_i32, %c0_i32_0 : i32, i32, i32
  }
  func.func @transform_2(%arg0: i32) -> (i32, i32, i32) {
    %c0_i32 = arith.constant 0 : i32
    %c0_i32_0 = arith.constant 0 : i32
    %c0_i32_1 = arith.constant 0 : i32
    return %arg0, %c0_i32, %c0_i32_0 : i32, i32, i32
  }
}

</mosaic_0001>

<bundles_post_ra>
// kernel: tpu_custom_call.1
= control target key start
LH: loop header
LB: loop body
LE: loop exit
PB: predicated region body
PF: predicated region fallthrough
CT: control target
= control target key end

     0   :  { %7 = vsyncpa [#allocation3], 0  ;;  %s812_s0 = inlined_call_operand.hbm [shape: f32[16,4,128], index: 0, kind: input, shape index: {}]   ;;  %s813_s1 = inlined_call_operand.hbm [shape: f32[64,1,128], index: 1, kind: input, shape index: {}]   ;;  %s814_s2 = inlined_call_operand.hbm [shape: f32[16,4,128], index: 2, kind: output, shape index: {}]  }
   0x1   :  { %9 = vsyncpa [#allocation3 + $0x1], 0 }
   0x2   :  { %10 = vsyncpa [#allocation6], 0 }
   0x3   :  { %12 = vsyncpa [#allocation6 + $0x1], 0 }
   0x4   :  { %13 = vsyncpa [#allocation4], 0 }
   0x5   :  { %15 = vsyncpa [#allocation4 + $0x1], 0  ;;  %s613_s9 = smov 0   ;;  %s615_s10 = smov 0  }
   0x6   :  { %s617_s11 = smov 0   ;;  %s619_s12 = smov 0  }
   0x7 LB: > { %s634_s13 = sadd.s32 4294967295, %s590_s12   ;;  %s376_s14 = sadd.s32 4294967294, %s590_s12   ;;  %s590_s12 = sphi %s619_s12, %s825_s12   ;;  %s586_s11 = sphi %s617_s11, %s824_s11   ;;  %s582_s10 = sphi %s615_s10, %s823_s10   ;;  %s578_s9 = sphi %s613_s9, %s822_s9  }
   0x8   : > { %s638_s15 = sadd.s32 1, %s590_s12   ;;  %s28_s16 = sadd.s32 1, %s586_s11 }
   0x9   : > { %s25_s17 = ssub.s32 %s590_s12, %s638_s15  ;;  %p35_p0 = scmp.ne.s32.totalorder %s586_s11, %s582_s10 }
   0xa   : > { %p26_p1 = scmp.eq.s32.totalorder %s25_s17, 0  ;;  %p36_p2 = scmp.eq.s32.totalorder %s590_s12, 0 }
   0xb   : > { %p41_p3 = scmp.ne.s32.totalorder %s582_s10, %s578_s9  ;;  %p42_p4 = scmp.eq.s32.totalorder %s634_s13, 0 }
   0xc   : > { %s650_s18 = scalar_select %p26_p1, %s586_s11, %s28_s16  }
   0xd   : > { %p652_p5 = por %p36_p2, %p35_p0  ;;  %p656_p6 = por %p42_p4, %p41_p3 }
   0xe   : > { %p91_p7 = scmp.eq.s32.totalorder %s634_s13, 1  ;;  %p97_p8 = scmp.eq.s32.totalorder %s376_s14, 1 }
   0xf   : > { %p412_p10 = scmp.lt.s32.totalorder %s590_s12, 2  ;;  %s672_s23 = sand.u32 1, %s586_s11  }
  0x10   : > { %p663_p11 = por %p91_p7, %p35_p0  ;;  %p667_p12 = por %p97_p8, %p41_p3 }
  0x11   : > { %s393_s24 = sshll.u32 %s590_s12, 5  ;;  %s379_s25 = sshll.u32 %s672_s23, 5 }
  0x12   : > { %s126_s28 = scalar_lea.hbm %s812_s0, %s393_s24  ;;  %s121_s30 = scalar_lea.vmem [#allocation2], %s379_s25 }
  0x13   : > { %s127_s29 = sshll.u32 %s126_s28, 4  ;;  %s129_s3 = sshll.u32 %s121_s30, 4  ;;  %s128_s29 = int_to_ptr.hbm [resolvable:$true] %s127_s29  ;;  %s130_s3 = int_to_ptr.vmem [resolvable:$true] %s129_s3 }
  0x14   : > { %p681_p13 = pnand %p412_p10, %p652_p5  ;;  %p384_p0 = scmp.ge.s32.totalorder %s590_s12, 1 }
  0x15   : > { %p158_p1 = scmp.lt.s32.totalorder %s590_s12, 3  ;;  %s118_s5 = scalar_lea.sflag [#allocation3], %s672_s23 }
  0x16   : > { %s460_s6 = sshra.s32 %s128_s29, 4  ;;  %p464_p3 = pneg %p681_p13  ;;  %s461_s6 = int_to_ptr.hbm [resolvable:$true] %s460_s6 }
  0x17   : > { %s462_s7 = scalar_lea.hbm %s461_s6, 32  ;;  %s467_s16 = scalar_lea.hbm %s812_s0, 64 }
  0x18   : > { %p463_p2 = scmp.ne.s32.totalorder %s461_s6, %s462_s7  ;;  %p468_p5 = scmp.lt.s32.totalorder %s461_s6, %s812_s0 }
  0x19   : > { %p469_p8 = scmp.lt.s32.totalorder %s467_s16, %s462_s7 }
  0x1a   : > { %p465_p4 = pnand %p464_p3, %p463_p2 }
  0x1b   : > { %p470_p10 = por %p469_p8, %p468_p5 }
  0x1c   : > { %p466_p7 = pneg %p465_p4 }
  0x1e   : > { %p471_p9 = pnand %p470_p10, %p466_p7 }
  0x20   : > { %474 = shalt.err (!%p471_p9)
}
  0x21   : > { %s592_s24 = smov 64   ;;  %s593_s25 = smov 4  }
  0x22   : > { %404 = dma.hbm_to_vmem [thread:$0]  (!%p681_p13), %s128_s29, 512, %s130_s3, %s118_s5, %s592_s24, %s592_s24, %s593_s25  }
  0x23   : > { %p705_p2 = pnand %p384_p0, %p158_p1  ;;  %s382_s27 = sshll.u32 %s672_s23, 3 }
  0x24   : > { %s383_s28 = sshll.u32 %s590_s12, 3  ;;  %s143_s14 = scalar_lea.vmem [#allocation5], %s382_s27 }
  0x25   : > { %s147_s7 = scalar_lea.hbm %s813_s1, %s383_s28  ;;  %s150_s16 = sshll.u32 %s143_s14, 4  ;;  %s151_s16 = int_to_ptr.vmem [resolvable:$true] %s150_s16 }
  0x26   : > { %s148_s8 = sshll.u32 %s147_s7, 4  ;;  %s140_s17 = scalar_lea.sflag [#allocation6], %s672_s23  ;;  %s149_s8 = int_to_ptr.hbm [resolvable:$true] %s148_s8 }
  0x27   : > { %s490_s19 = sshra.s32 %s149_s8, 4  ;;  %s497_s24 = scalar_lea.hbm %s813_s1, 64  ;;  %s491_s19 = int_to_ptr.hbm [resolvable:$true] %s490_s19 }
  0x28   : > { %s492_s29 = scalar_lea.hbm %s491_s19, 8  ;;  %p498_p4 = scmp.lt.s32.totalorder %s491_s19, %s813_s1 }
  0x29   : > { %p493_p9 = scmp.ne.s32.totalorder %s491_s19, %s492_s29  ;;  %p499_p7 = scmp.lt.s32.totalorder %s497_s24, %s492_s29 }
  0x2b   : > { %p495_p0 = pnand %p493_p9, %p464_p3  ;;  %p500_p5 = por %p499_p7, %p498_p4 }
  0x2d   : > { %p496_p1 = pneg %p495_p0 }
  0x2f   : > { %p501_p8 = pnand %p500_p5, %p496_p1 }
  0x31   : > { %504 = shalt.err (!%p501_p8)
}
  0x32   : > { %s594_s23 = smov 16   ;;  %s595_s27 = smov 1  }
  0x33   : > { %407 = dma.hbm_to_vmem [thread:$0]  (!%p681_p13), %s149_s8, 128, %s151_s16, %s140_s17, %s594_s23, %s594_s23, %s595_s27  }
  0x34   : > { %162 = sbr.rel (%p705_p2) target bundleno = 81 (0x51), region = 28  ;;  %s729_s30 = sand.u32 (!%p705_p2), 1, %s582_s10  }
  0x35   : > { %s385_s6 = sshll.u32 (!%p705_p2), %s729_s30, 5  ;;  %s165_s7 = scalar_lea.sflag (!%p705_p2), [#allocation3], %s729_s30 }
  0x36   : > { %s733_s14 = scalar_lea.vmem (!%p705_p2), [#allocation2], %s385_s6 }
  0x39   : > { %565 = dma.done.wait (%p656_p6), %s165_s7, 512  }
  0x3a   : > { %567 = vsyncadd (%p656_p6), %s165_s7, 4294966784  ;;  %s386_s4 = sshll.u32 %s729_s30, 3  ;;  %s175_s26 = scalar_lea.sflag [#allocation6], %s729_s30 }
  0x3b   : > { %s741_s8 = scalar_lea.vmem [#allocation5], %s386_s4 }
  0x3c   : > { %569 = dma.done.wait (%p656_p6), %s175_s26, 128  }
  0x3d   : > { %571 = vsyncadd (%p656_p6), %s175_s26, 4294967168  ;;  %s394_s16 = sshll.u32 %s634_s13, 5  ;;  %s748_s17 = scalar_lea.vmem [#allocation7], %s385_s6  ;;  %v208_v0 = vld [vmem:[%s733_s14] sm:$0xf] }
  0x3e   : > { %s277_s19 = sshll.u32 %s748_s17, 4  ;;  %v452_v1 = vld [vmem:[%s741_s8] ss:$0 sm:$0xff]  ;;  %v209_v2 = vld [vmem:[%s733_s14 + $0x4] sm:$0xf]  ;;  %s758_s3 = scalar_lea.hbm %s814_s2, %s394_s16  ;;  %s278_s19 = int_to_ptr.vmem [resolvable:$true] %s277_s19 }
  0x3f   : > { %v453_v3 = vld [vmem:[%s741_s8 + $0x1] ss:$0 sm:$0xff]  ;;  %v248_v4 = vadd.f32 %v452_v1, %v208_v0  ;;  %v454_v6 = vld [vmem:[%s741_s8 + $0x2] ss:$0 sm:$0xff]  ;;  %v211_v8 = vld [vmem:[%s733_s14 + $0xc] sm:$0xf] }
  0x40   : > { %v210_v5 = vld [vmem:[%s733_s14 + $0x8] sm:$0xf]  ;;  %v249_v7 = vadd.f32 %v453_v3, %v209_v2  ;;  %v212_v11 = vld [vmem:[%s733_s14 + $0x10] sm:$0xf]  ;;  %s279_s13 = sshll.u32 %s758_s3, 4  ;;  %s265_s5 = scalar_lea.sflag [#allocation4], %s729_s30  ;;  %s280_s13 = int_to_ptr.hbm [resolvable:$true] %s279_s13 }
  0x41   : > { %v455_v9 = vld [vmem:[%s741_s8 + $0x3] ss:$0 sm:$0xff]  ;;  %256 = vst [vmem:[%s748_s17] sm:$0xf] %v248_v4  ;;  %v250_v10 = vadd.f32 %v454_v6, %v210_v5  ;;  %v456_v13 = vld [vmem:[%s741_s8 + $0x4] ss:$0 sm:$0xff]  ;;  %s534_s24 = sshra.s32 %s280_s13, 4  ;;  %s535_s24 = int_to_ptr.hbm [resolvable:$true] %s534_s24 }
  0x42   : > { %257 = vst [vmem:[%s748_s17 + $0x4] sm:$0xf] %v249_v7  ;;  %v251_v12 = vadd.f32 %v455_v9, %v211_v8  ;;  %v213_v14 = vld [vmem:[%s733_s14 + $0x14] sm:$0xf]  ;;  %v457_v15 = vld [vmem:[%s741_s8 + $0x5] ss:$0 sm:$0xff]  ;;  %v252_v16 = vadd.f32 %v456_v13, %v212_v11  ;;  %p541_p10 = scmp.lt.s32.totalorder %s535_s24, %s814_s2 }
  0x43   : > { %258 = vst [vmem:[%s748_s17 + $0x8] sm:$0xf] %v250_v10  ;;  %v214_v17 = vld [vmem:[%s733_s14 + $0x18] sm:$0xf]  ;;  %v253_v18 = vadd.f32 %v457_v15, %v213_v14  ;;  %v458_v19 = vld [vmem:[%s741_s8 + $0x6] ss:$0 sm:$0xff] }
  0x44   : > { %259 = vst [vmem:[%s748_s17 + $0xc] sm:$0xf] %v251_v12  ;;  %v215_v20 = vld [vmem:[%s733_s14 + $0x1c] sm:$0xf]  ;;  %v459_v21 = vld [vmem:[%s741_s8 + $0x7] ss:$0 sm:$0xff]  ;;  %v254_v22 = vadd.f32 %v458_v19, %v214_v17 }
  0x45   : > { %260 = vst [vmem:[%s748_s17 + $0x10] sm:$0xf] %v252_v16  ;;  %v255_v23 = vadd.f32 %v459_v21, %v215_v20  ;;  %s536_s25 = scalar_lea.hbm %s535_s24, 32  ;;  %s540_s27 = scalar_lea.hbm %s814_s2, 64 }
  0x46   : > { %261 = vst [vmem:[%s748_s17 + $0x14] sm:$0xf] %v253_v18  ;;  %p537_p6 = scmp.ne.s32.totalorder %s535_s24, %s536_s25  ;;  %p542_p2 = scmp.lt.s32.totalorder %s540_s27, %s536_s25 }
  0x47   : > { %262 = vst [vmem:[%s748_s17 + $0x18] sm:$0xf] %v254_v22 }
  0x48   : > { %263 = vst [vmem:[%s748_s17 + $0x1c] sm:$0xf] %v255_v23  ;;  %p538_p13 = pnand %p537_p6, %p663_p11  ;;  %p543_p9 = por %p542_p2, %p541_p10 }
  0x4a   : > { %p539_p3 = pneg %p538_p13 }
  0x4c   : > { %p544_p0 = pnand %p543_p9, %p539_p3 }
  0x4e   : > { %547 = shalt.err (!%p544_p0)
}
  0x4f   : > { %s596_s30 = smov 64   ;;  %s597_s14 = smov 4  }
  0x50   : > { %399 = dma.vmem_to_hbm [thread:$0]  (%p663_p11), %s278_s19, 512, %s280_s13, %s265_s5, %s596_s30, %s596_s30, %s597_s14  }
  0x51 PF: > { %s294_s4 = sand.u32 1, %s578_s9   ;;  %p821_p1 = scmp.ge.s32.totalorder %s590_s12, 2 }
  0x52   : > { %s295_s26 = scalar_lea.sflag [#allocation4], %s294_s4 }
  0x53   : > { %p409_p4 = pnand %p821_p1, %p667_p12 }
  0x55   : > { %p410_p7 = pneg %p409_p4 }
  0x57   : > { %573 = dma.done.wait (%p410_p7), %s295_s26, 512  }
  0x58   : > { %575 = vsyncadd (%p410_p7), %s295_s26, 4294966784  ;;  %p18_p5 = scmp.ge.s32.totalorder %s638_s15, 4   ;;  %s822_s9 = smov %s582_s10 }
  0x59   : > { %s823_s10 = smov %s586_s11  ;;  %s824_s11 = smov %s650_s18 }
  0x5a   : > { %s825_s12 = smov %s638_s15  ;;  %20 = sbr.rel (!%p18_p5) target bundleno = 7 (0x7), region = 86 }
  0x5f   :  { %301 = vsyncpa [#allocation3], 1 }
  0x60   :  { %303 = vsyncpa [#allocation3 + $0x1], 1 }
  0x61   :  { %304 = vsyncpa [#allocation6], 1 }
  0x62   :  { %306 = vsyncpa [#allocation6 + $0x1], 1 }
  0x63   :  { %307 = vsyncpa [#allocation4], 1 }
  0x64   :  { %309 = vsyncpa [#allocation4 + $0x1], 1 }

</bundles_post_ra>
